<compile_context>
chip_gen: v7x
topology: tpu7x:2x2x1
jax: 0.10.0
libtpu: 0.0.40
codegen_flags: <defaults>
</compile_context>

<pallas_src>
import jax
import jax.numpy as jnp
from jax.experimental import pallas as pl
from jax.experimental.pallas import tpu as pltpu

_MIB = 1024 * 1024


def _se_kernel(x_ref, w1_ref, b1_ref, w2_ref, b2_ref, out_ref, mean_ref):
    # One block of Bb batch elements per grid step.
    #   x_ref:   (Bb, C, HW)  io dtype, channels on sublanes, flat spatial on lanes
    #   w1_ref:  (C, Cr)      fc1 weight^T with the 1/HW pool normalization folded in
    #   b1_ref:  (1, Cr)      fc1 bias
    #   w2_ref:  (Cr, C)      fc2 weight^T restricted to even output channels
    #   b2_ref:  (1, C)       fc2 bias restricted to even output channels
    #   out_ref: (Bb, C, HW)  io dtype
    #   mean_ref:(Bb, 1, C)   float32 gate
    x = x_ref[...]                                              # (Bb, C, HW) io dtype

    # Global average pool: lane sum in f32 (1/HW is folded into w1, no divide).
    pooled = jnp.sum(x.astype(jnp.float32), axis=-1)            # (Bb, C)

    # fc1 (1x1 conv == matmul) + ReLU.
    h = jnp.dot(pooled, w1_ref[...],
                preferred_element_type=jnp.float32) + b1_ref[...]
    h = jnp.maximum(h, 0.0)                                     # (Bb, Cr)

    # fc2 (even output channels only) + sigmoid  ->  "mean" gate.
    logits = jnp.dot(h, w2_ref[...],
                     preferred_element_type=jnp.float32) + b2_ref[...]
    gate = jax.nn.sigmoid(logits)                               # (Bb, C), f32

    mean_ref[...] = gate[:, None, :]                            # (Bb, 1, C)

    # Gating multiply stays in the I/O dtype: halves vreg pressure / VPU bytes on
    # the dominant elementwise op for bf16 I/O (bf16 VALU on v6e/v7x); on v5e the
    # compiler upcasts transparently.
    out_ref[...] = x * gate.astype(x.dtype)[:, :, None]         # (Bb, C, HW)


def _vmem_capacity_bytes():
    """Physical VMEM of the attached TPU; conservative 64 MiB (v7x) fallback."""
    try:
        info = pltpu.get_tpu_info()
        cap = getattr(info, "vmem_capacity_bytes", None)
        if cap:
            return int(cap)
    except Exception:
        pass
    return 64 * _MIB


def se_module_forward(x_nchw, w1, b1, w2, b2, *, io_dtype=None):
    """Eval-mode SEModule forward.

    x_nchw : (B, C, H, W)
    w1     : (C//r, C, 1, 1)   fc1 weight  (PyTorch Conv2d layout)
    b1     : (C//r,)           fc1 bias
    w2     : (2*C, C//r, 1, 1) fc2 weight
    b2     : (2*C,)            fc2 bias
    io_dtype: dtype used for the streamed x/out arrays (e.g. jnp.bfloat16 to halve
              HBM traffic on the bandwidth-bound path).  Defaults to x's dtype.
              Pooling / fc1 / fc2 / sigmoid always run in float32.

    Returns (x * mean, mean) with mean of shape (B, C, 1, 1), like the module.
    """
    B, C, H, W = x_nchw.shape
    Cr = w1.shape[0]
    HW = H * W
    if io_dtype is None:
        io_dtype = x_nchw.dtype
    io_dtype = jnp.dtype(io_dtype)

    # Reshape of a contiguous array is free; only cast when the dtype actually
    # changes (each wrapper-side astype/pad/slice is a full extra HBM pass).
    x3 = x_nchw.reshape(B, C, HW)
    if x3.dtype != io_dtype:
        x3 = x3.astype(io_dtype)

    # 1x1-conv weights -> (in, out) matrices; fold the 1/HW pooling normalization
    # into fc1's weight so the kernel only needs a lane sum.
    w1t = (jnp.transpose(w1[:, :, 0, 0]) * (1.0 / HW)).astype(jnp.float32)  # (C, Cr)
    b1r = b1.reshape(1, Cr).astype(jnp.float32)
    # "mean = sigmoid(fc2(.))[:, ::2]" -> only even output channels of fc2 used.
    w2t = jnp.transpose(w2[::2, :, 0, 0]).astype(jnp.float32)               # (Cr, C)
    b2r = b2[::2].reshape(1, C).astype(jnp.float32)

    # ---- Generation-aware block sizing -------------------------------------
    vmem_cap = _vmem_capacity_bytes()
    if vmem_cap >= 100 * _MIB:          # v5e / v6e: 128 MiB physical VMEM
        target_block = 12 * _MIB
    else:                               # v7x: 64 MiB per TensorCore
        target_block = 6 * _MIB

    itemsize = io_dtype.itemsize
    per_batch_io = C * HW * itemsize
    f32_tmp_per_batch = C * HW * 4 if io_dtype != jnp.float32 else 0

    bb_max = max(1, min(B, target_block // max(per_batch_io, 1)))
    Bb = 1
    for d in range(1, B + 1):           # largest divisor of B not exceeding bb_max
        if B % d == 0 and d <= bb_max:
            Bb = d
    n_steps = B // Bb

    # VMEM budget: double-buffered x and out blocks, the in-kernel f32 pooling
    # temp (bf16 I/O only), double-buffered weights, plus headroom.
    block_io = Bb * per_batch_io
    f32_tmp = Bb * f32_tmp_per_batch
    weight_bytes = (C * Cr + Cr + Cr * C + C) * 4
    need = 4 * block_io + f32_tmp + 2 * weight_bytes + 4 * _MIB
    if need > vmem_cap:
        # TODO(synk): two-phase HW-tiled restructure for shapes where a single
        # batch element no longer fits VMEM (see header comment).
        raise NotImplementedError(
            f"per-step block needs {need / _MIB:.1f} MiB VMEM but only "
            f"{vmem_cap / _MIB:.1f} MiB is available; spatial tiling TODO")
    vmem_limit = int(min(vmem_cap, max(16 * _MIB, need)))

    x_spec = pl.BlockSpec((Bb, C, HW), lambda i: (i, 0, 0))
    if n_steps >= 3:
        # Deeper input buffering hides the first-step DMA ramp on short grids.
        try:
            x_spec = pl.BlockSpec((Bb, C, HW), lambda i: (i, 0, 0),
                                  pipeline_mode=pl.Buffered(3))
        except TypeError:
            pass  # older jax: keep default double buffering

    # TODO(synk): use pltpu.CORE_PARALLEL on v7x so both TensorCores drive DMAs.
    out3, gate3 = pl.pallas_call(
        _se_kernel,
        grid=(n_steps,),
        in_specs=[
            x_spec,                                           # x: Bb batches / step
            pl.BlockSpec((C, Cr), lambda i: (0, 0)),          # weights VMEM-resident
            pl.BlockSpec((1, Cr), lambda i: (0, 0)),
            pl.BlockSpec((Cr, C), lambda i: (0, 0)),
            pl.BlockSpec((1, C), lambda i: (0, 0)),
        ],
        out_specs=(
            pl.BlockSpec((Bb, C, HW), lambda i: (i, 0, 0)),
            pl.BlockSpec((Bb, 1, C), lambda i: (i, 0, 0)),
        ),
        out_shape=(
            jax.ShapeDtypeStruct((B, C, HW), io_dtype),
            jax.ShapeDtypeStruct((B, 1, C), jnp.float32),
        ),
        compiler_params=pltpu.CompilerParams(
            dimension_semantics=("parallel",),
            vmem_limit_bytes=vmem_limit,
        ),
    )(x3, w1t, b1r, w2t, b2r)

    out = out3.reshape(B, C, H, W)
    mean = gate3.reshape(B, C, 1, 1)
    return out, mean


def _reference(x_nchw, w1, b1, w2, b2):
    """Pure-JAX reference of the eval-mode PyTorch forward."""
    pooled = jnp.mean(x_nchw, axis=(2, 3), keepdims=True)          # (B,C,1,1)
    h = jnp.einsum("bcxy,oc->boxy", pooled, w1[:, :, 0, 0]) + b1[None, :, None, None]
    h = jnp.maximum(h, 0.0)
    s = jnp.einsum("bcxy,oc->boxy", h, w2[:, :, 0, 0]) + b2[None, :, None, None]
    s = jax.nn.sigmoid(s)
    mean = s[:, ::2]
    return x_nchw * mean, mean


if __name__ == "__main__":
    # Module config: channels=64, reduction_=41 -> reduction=4 (gt list unused in
    # the eval forward). fc1: 64 -> 16, fc2: 16 -> 128.
    B, C, H, W = 2, 64, 16, 16
    reduction = 4
    Cr = C // reduction

    key = jax.random.PRNGKey(0)
    kx, k1, k2, k3, k4 = jax.random.split(key, 5)

    x = jax.random.normal(kx, (B, C, H, W), dtype=jnp.float32)

    # Deterministic synthetic parameters (PyTorch Conv2d shapes).
    w1 = jax.random.normal(k1, (Cr, C, 1, 1), dtype=jnp.float32) * 0.1
    b1 = jax.random.normal(k2, (Cr,), dtype=jnp.float32) * 0.1
    w2 = jax.random.normal(k3, (2 * C, Cr, 1, 1), dtype=jnp.float32) * 0.1
    b2 = jax.random.normal(k4, (2 * C,), dtype=jnp.float32) * 0.1

    ref_out, ref_mean = _reference(x, w1, b1, w2, b2)

    # float32 I/O path (tight numerical check).
    out, mean = se_module_forward(x, w1, b1, w2, b2)
    jax.block_until_ready(out)
    jax.block_until_ready(mean)
    assert out.shape == (B, C, H, W) and mean.shape == (B, C, 1, 1)
    assert jnp.allclose(out, ref_out, atol=1e-4, rtol=1e-4)
    assert jnp.allclose(mean, ref_mean, atol=1e-4, rtol=1e-4)

    # bfloat16 I/O path (halves HBM bytes on the bandwidth-bound path; gate math
    # stays f32 in-kernel; note x itself is rounded to bf16 -> loose tolerances).
    out_bf, mean_bf = se_module_forward(x, w1, b1, w2, b2, io_dtype=jnp.bfloat16)
    jax.block_until_ready(out_bf)
    jax.block_until_ready(mean_bf)
    assert out_bf.dtype == jnp.bfloat16
    assert jnp.allclose(out_bf.astype(jnp.float32), ref_out, atol=1e-1, rtol=1e-1)
    assert jnp.allclose(mean_bf, ref_mean, atol=1e-2, rtol=1e-2)

    print("KERNEL_OK")
</pallas_src>

<mosaic_0001>
module attributes {stable_mosaic.version = 11 : i64} {
  func.func @_se_kernel(%arg0: i32, %arg1: memref<2x64x256xf32, #tpu.memory_space<vmem>>, %arg2: memref<64x16xf32, #tpu.memory_space<vmem>>, %arg3: memref<1x16xf32, #tpu.memory_space<vmem>>, %arg4: memref<16x64xf32, #tpu.memory_space<vmem>>, %arg5: memref<1x64xf32, #tpu.memory_space<vmem>>, %arg6: memref<2x64x256xf32, #tpu.memory_space<vmem>>, %arg7: memref<2x1x64xf32, #tpu.memory_space<vmem>>) attributes {dimension_semantics = [#tpu.dimension_semantics<parallel>], iteration_bounds = array<i64: 1>, scalar_prefetch = 0 : i64, scratch_operands = 0 : i64, tpu.core_type = #tpu.core_type<tc>, window_params = [{transform_indices = @transform_0, window_bounds = array<i64: 2, 64, 256>}, {pipeline_mode = #tpu.pipeline_mode<synchronous>, transform_indices = @transform_1, window_bounds = array<i64: 64, 16>}, {pipeline_mode = #tpu.pipeline_mode<synchronous>, transform_indices = @transform_2, window_bounds = array<i64: 1, 16>}, {pipeline_mode = #tpu.pipeline_mode<synchronous>, transform_indices = @transform_3, window_bounds = array<i64: 16, 64>}, {pipeline_mode = #tpu.pipeline_mode<synchronous>, transform_indices = @transform_4, window_bounds = array<i64: 1, 64>}, {transform_indices = @transform_5, window_bounds = array<i64: 2, 64, 256>}, {transform_indices = @transform_6, window_bounds = array<i64: 2, 1, 64>}]} {
    %c0 = arith.constant 0 : index
    %c0_0 = arith.constant 0 : index
    %c0_1 = arith.constant 0 : index
    %0 = vector.load %arg1[%c0, %c0_0, %c0_1] : memref<2x64x256xf32, #tpu.memory_space<vmem>>, vector<2x64x256xf32>
    %cst = arith.constant dense<0.000000e+00> : vector<2x64xf32>
    %1 = vector.multi_reduction <add>, %0, %cst [2] : vector<2x64x256xf32> to vector<2x64xf32>
    %c0_2 = arith.constant 0 : index
    %c0_3 = arith.constant 0 : index
    %2 = vector.load %arg2[%c0_2, %c0_3] : memref<64x16xf32, #tpu.memory_space<vmem>>, vector<64x16xf32>
    %cst_4 = arith.constant dense<0.000000e+00> : vector<2x16xf32>
    %3 = tpu.matmul %1, %2, %cst_4 {dimension_numbers = #tpu.dot_dimension_numbers<[1], [0], [0], [1], [0, 0, 1, 1], [], []>} : vector<2x64xf32>, vector<64x16xf32>, vector<2x16xf32> -> vector<2x16xf32>
    %c0_5 = arith.constant 0 : index
    %c0_6 = arith.constant 0 : index
    %4 = vector.load %arg3[%c0_5, %c0_6] : memref<1x16xf32, #tpu.memory_space<vmem>>, vector<1x16xf32>
    %5 = vector.broadcast %4 : vector<1x16xf32> to vector<2x16xf32>
    %6 = arith.addf %3, %5 : vector<2x16xf32>
    %cst_7 = arith.constant 0.000000e+00 : f32
    %7 = vector.broadcast %cst_7 : f32 to vector<2x16xf32>
    %8 = arith.maximumf %6, %7 : vector<2x16xf32>
    %c0_8 = arith.constant 0 : index
    %c0_9 = arith.constant 0 : index
    %9 = vector.load %arg4[%c0_8, %c0_9] : memref<16x64xf32, #tpu.memory_space<vmem>>, vector<16x64xf32>
    %cst_10 = arith.constant dense<0.000000e+00> : vector<2x64xf32>
    %10 = tpu.matmul %8, %9, %cst_10 {dimension_numbers = #tpu.dot_dimension_numbers<[1], [0], [0], [1], [0, 0, 1, 1], [], []>} : vector<2x16xf32>, vector<16x64xf32>, vector<2x64xf32> -> vector<2x64xf32>
    %c0_11 = arith.constant 0 : index
    %c0_12 = arith.constant 0 : index
    %11 = vector.load %arg5[%c0_11, %c0_12] : memref<1x64xf32, #tpu.memory_space<vmem>>, vector<1x64xf32>
    %12 = vector.broadcast %11 : vector<1x64xf32> to vector<2x64xf32>
    %13 = arith.addf %10, %12 : vector<2x64xf32>
    %14 = arith.negf %13 : vector<2x64xf32>
    %15 = math.exp %14 : vector<2x64xf32>
    %cst_13 = arith.constant 1.000000e+00 : f32
    %16 = vector.broadcast %cst_13 : f32 to vector<2x64xf32>
    %17 = arith.addf %16, %15 : vector<2x64xf32>
    %18 = arith.divf %16, %17 : vector<2x64xf32>
    %19 = vector.shape_cast %18 : vector<2x64xf32> to vector<2x1x64xf32>
    %c0_14 = arith.constant 0 : index
    %c0_15 = arith.constant 0 : index
    %c0_16 = arith.constant 0 : index
    %20 = vector.load %arg7[%c0_14, %c0_15, %c0_16] : memref<2x1x64xf32, #tpu.memory_space<vmem>>, vector<2x1x64xf32>
    tpu.vector_store %arg7[%c0_14, %c0_15, %c0_16], %19 {strides = array<i32>} : memref<2x1x64xf32, #tpu.memory_space<vmem>>, vector<2x1x64xf32>,
    %21 = vector.shape_cast %18 : vector<2x64xf32> to vector<2x64x1xf32>
    %22 = vector.broadcast %21 : vector<2x64x1xf32> to vector<2x64x256xf32>
    %23 = arith.mulf %0, %22 : vector<2x64x256xf32>
    %c0_17 = arith.constant 0 : index
    %c0_18 = arith.constant 0 : index
    %c0_19 = arith.constant 0 : index
    %24 = vector.load %arg6[%c0_17, %c0_18, %c0_19] : memref<2x64x256xf32, #tpu.memory_space<vmem>>, vector<2x64x256xf32>
    tpu.vector_store %arg6[%c0_17, %c0_18, %c0_19], %23 {strides = array<i32>} : memref<2x64x256xf32, #tpu.memory_space<vmem>>, vector<2x64x256xf32>,
    return
  }
  func.func @transform_0(%arg0: i32) -> (i32, i32, i32) {
    %c0_i32 = arith.constant 0 : i32
    %c0_i32_0 = arith.constant 0 : i32
    %c0_i32_1 = arith.constant 0 : i32
    return %arg0, %c0_i32, %c0_i32_0 : i32, i32, i32
  }
  func.func @transform_1(%arg0: i32) -> (i32, i32) {
    %c0_i32 = arith.constant 0 : i32
    %c0_i32_0 = arith.constant 0 : i32
    %c0_i32_1 = arith.constant 0 : i32
    return %c0_i32, %c0_i32_0 : i32, i32
  }
  func.func @transform_2(%arg0: i32) -> (i32, i32) {
    %c0_i32 = arith.constant 0 : i32
    %c0_i32_0 = arith.constant 0 : i32
    %c0_i32_1 = arith.constant 0 : i32
    return %c0_i32, %c0_i32_0 : i32, i32
  }
  func.func @transform_3(%arg0: i32) -> (i32, i32) {
    %c0_i32 = arith.constant 0 : i32
    %c0_i32_0 = arith.constant 0 : i32
    %c0_i32_1 = arith.constant 0 : i32
    return %c0_i32, %c0_i32_0 : i32, i32
  }
  func.func @transform_4(%arg0: i32) -> (i32, i32) {
    %c0_i32 = arith.constant 0 : i32
    %c0_i32_0 = arith.constant 0 : i32
    %c0_i32_1 = arith.constant 0 : i32
    return %c0_i32, %c0_i32_0 : i32, i32
  }
  func.func @transform_5(%arg0: i32) -> (i32, i32, i32) {
    %c0_i32 = arith.constant 0 : i32
    %c0_i32_0 = arith.constant 0 : i32
    %c0_i32_1 = arith.constant 0 : i32
    return %arg0, %c0_i32, %c0_i32_0 : i32, i32, i32
  }
  func.func @transform_6(%arg0: i32) -> (i32, i32, i32) {
    %c0_i32 = arith.constant 0 : i32
    %c0_i32_0 = arith.constant 0 : i32
    %c0_i32_1 = arith.constant 0 : i32
    return %arg0, %c0_i32, %c0_i32_0 : i32, i32, i32
  }
}

</mosaic_0001>

<bundles_post_ra>
// kernel: tpu_custom_call.1
= control target key start
LH: loop header
LB: loop body
LE: loop exit
PB: predicated region body
PF: predicated region fallthrough
CT: control target
= control target key end

     0   :  { %12 = vsyncpa [#allocation3], 0  ;;  %s1023_s0 = inlined_call_operand.hbm [shape: f32[2,64,256], index: 0, kind: input, shape index: {}]   ;;  %s1024_s1 = inlined_call_operand.vmem [shape: f32[64,16], index: 1, kind: input, shape index: {}]   ;;  %s1025_s2 = inlined_call_operand.vmem [shape: f32[1,16], index: 2, kind: input, shape index: {}]   ;;  %s1026_s3 = inlined_call_operand.vmem [shape: f32[16,64], index: 3, kind: input, shape index: {}]   ;;  %s1027_s4 = inlined_call_operand.vmem [shape: f32[1,64], index: 4, kind: input, shape index: {}]   ;;  %s1028_s5 = inlined_call_operand.hbm [shape: f32[2,64,256], index: 5, kind: output, shape index: {0}]   ;;  %s1029_s6 = inlined_call_operand.hbm [shape: f32[2,1,64], index: 6, kind: output, shape index: {1}]  }
   0x1   :  { %13 = vsyncpa [#allocation4], 0 }
   0x2   :  { %14 = vsyncpa [#allocation7], 0  ;;  %s747_s21 = smov [#allocation2]   ;;  %s675_s25 = scalar_lea.hbm %s1023_s0, 4096 }
   0x3   :  { %s20_s22 = sshll.u32 %s747_s21, 4  ;;  %p676_p0 = scmp.ne.s32.totalorder %s1023_s0, %s675_s25  ;;  %s21_s22 = int_to_ptr.vmem [resolvable:$true] %s20_s22 }
   0x4   :  { %p679_p1 = scmp.lt.u32.totalorder %s675_s25, %s1023_s0 }
   0x6   :  { %p681_p2 = pnand %p679_p1, %p676_p0 }
   0x8   :  { %684 = shalt.err (!%p681_p2)
}
   0x9   :  { %s685_s30 = scalar_lea.vmem %s21_s22, 4096  ;;  %p690_p4 = scmp.lt.s32.totalorder %s21_s22, %s21_s22 }
   0xa   :  { %p686_p3 = scmp.ne.s32.totalorder %s21_s22, %s685_s30  ;;  %p691_p5 = scmp.lt.s32.totalorder %s685_s30, %s685_s30 }
   0xc   :  { %p692_p6 = por %p691_p5, %p690_p4 }
   0xe   :  { %p693_p7 = pnand %p692_p6, %p686_p3 }
  0x10   :  { %696 = shalt.err (!%p693_p7)
}
  0x11   :  { %s748_s7 = smov 256   ;;  %s749_s8 = smov 16  }
  0x12   :  { %26 = dma.hbm_to_vmem [thread:$0]  %s1023_s0, 4096, %s21_s22, [#allocation3], %s748_s7, %s748_s7, %s749_s8  }
  0x13   :  { %741 = dma.done.wait [#allocation3], 4096  }
  0x14   :  { %742 = vsyncadd [#allocation3], 4294963200  ;;  %v807_v0 = vld [vmem:[#allocation2 + $0x80] sm:$0xff]  ;;  %v809_v1 = vld [vmem:[#allocation2 + $0x88] sm:$0xff]  ;;  %v750_v51 = vmov 0.0|0.0   ;;  %vm751_vm0 = vmmov 0  }
  0x15   :  { %v811_v2 = vld [vmem:[#allocation2] sm:$0xff]  ;;  %v94_v3 = vadd.f32 %v809_v1, %v807_v0  ;;  %v815_v4 = vld [vmem:[#allocation2 + $0x8] sm:$0xff]  ;;  %v817_v5 = vld [vmem:[#allocation2 + $0x90] sm:$0xff]  ;;  %646 = vmatprep.subr.bf16.mxu0 %v750_v51  ;;  %658 = vmatprep.subr.bf16.mxu1 %v750_v51  ;;  %v752_v61 = vmov 0.0   ;;  %vm160_vm1 = vcmask 130112   ;;  %vm167_vm2 = vcmask 195712  }
  0x16   :  { %v819_v6 = vld [vmem:[#allocation2 + $0x98] sm:$0xff]  ;;  %v70_v7 = vadd.f32 %v815_v4, %v811_v2  ;;  %v823_v8 = vld [vmem:[#allocation2 + $0x10] sm:$0xff]  ;;  %v831_v12 = vld [vmem:[#allocation2 + $0xa0] sm:$0xff]  ;;  %636 = vmatprep.mubr.msk.f32.mxu0 %vm751_vm0, %v752_v61  ;;  %643 = vmatprep.mubr.msk.f32.mxu1 %vm751_vm0, %v752_v61  ;;  %vm174_vm3 = vcmask 261312   ;;  %vm181_vm4 = vcmask 326912   ;;  %vm188_vm5 = vcmask 392512  }
  0x17   :  { %v825_v9 = vld [vmem:[#allocation2 + $0x18] sm:$0xff]  ;;  %95 = vadd.xlane.f32.xlu1 %v94_v3  ;;  %v97_v10 = vadd.f32 %v819_v6, %v817_v5  ;;  %v833_v13 = vld [vmem:[#allocation2 + $0xa8] sm:$0xff]  ;;  %v835_v14 = vld [vmem:[#allocation2 + $0x20] sm:$0xff]  ;;  %vm195_vm6 = vcmask 458112   ;;  %vm202_vm7 = vcmask 523712   ;;  %vm243_vm8 = vcmask 1041409  }
  0x18   :  { %71 = vadd.xlane.f32.xlu0 %v70_v7  ;;  %v73_v11 = vadd.f32 %v825_v9, %v823_v8  ;;  %v837_v15 = vld [vmem:[#allocation2 + $0x28] sm:$0xff]  ;;  %v100_v16 = vadd.f32 %v833_v13, %v831_v12  ;;  %v843_v18 = vld [vmem:[#allocation2 + $0xb0] sm:$0xff]  ;;  %v845_v19 = vld [vmem:[#allocation2 + $0xb8] sm:$0xff]  ;;  %vm245_vm9 = vcmask 523264   ;;  %vm328_vm10 = vcmask 130048  }
  0x19   :  { %v76_v17 = vadd.f32 %v837_v15, %v835_v14  ;;  %v847_v20 = vld [vmem:[#allocation2 + $0x30] sm:$0xff]  ;;  %v849_v21 = vld [vmem:[#allocation2 + $0x38] sm:$0xff]  ;;  %v103_v22 = vadd.f32 %v845_v19, %v843_v18  ;;  %v855_v24 = vld [vmem:[#allocation2 + $0xc0] sm:$0xff]  ;;  %vm433_vm11 = vcmask 516096  }
  0x1a   :  { %v79_v23 = vadd.f32 %v849_v21, %v847_v20  ;;  %v857_v25 = vld [vmem:[#allocation2 + $0xc8] sm:$0xff]  ;;  %v859_v26 = vld [vmem:[#allocation2 + $0x40] sm:$0xff]  ;;  %v867_v30 = vld [vmem:[#allocation2 + $0xd0] sm:$0xff] }
  0x1b   :  { %98 = vadd.xlane.f32.xlu1 %v97_v10  ;;  %v861_v27 = vld [vmem:[#allocation2 + $0x48] sm:$0xff]  ;;  %v106_v28 = vadd.f32 %v857_v25, %v855_v24  ;;  %1034 = vst [vmem:[#allocation11_spill] sm:$0xff] %v867_v30  ;;  %v869_v31 = vld [vmem:[#allocation2 + $0xd8] sm:$0xff]  ;;  %v871_v32 = vld [vmem:[#allocation2 + $0x50] sm:$0xff]  ;;  %v149_v10 = vlaneseq }
  0x1c   :  { %74 = vadd.xlane.f32.xlu0 %v73_v11  ;;  %v82_v29 = vadd.f32 %v861_v27, %v859_v26  ;;  %1035 = vst [vmem:[#allocation12_spill] sm:$0xff] %v869_v31  ;;  %v873_v33 = vld [vmem:[#allocation2 + $0x58] sm:$0xff]  ;;  %v109_v34 = vadd.f32 %v869_v31, %v867_v30  ;;  %v879_v36 = vld [vmem:[#allocation2 + $0xe0] sm:$0xff]  ;;  %v881_v37 = vld [vmem:[#allocation2 + $0xe8] sm:$0xff] }
  0x1d   :  { %v85_v35 = vadd.f32 %v873_v33, %v871_v32  ;;  %v883_v38 = vld [vmem:[#allocation2 + $0x60] sm:$0xff]  ;;  %v885_v39 = vld [vmem:[#allocation2 + $0x68] sm:$0xff]  ;;  %v112_v40 = vadd.f32 %v881_v37, %v879_v36  ;;  %v891_v42 = vld [vmem:[#allocation2 + $0xf0] sm:$0xff] }
  0x1e   :  { %v88_v41 = vadd.f32 %v885_v39, %v883_v38  ;;  %1036 = vst [vmem:[#allocation13_spill] sm:$0xff] %v891_v42  ;;  %v893_v43 = vld [vmem:[#allocation2 + $0xf8] sm:$0xff]  ;;  %v895_v44 = vld [vmem:[#allocation2 + $0x70] sm:$0xff]  ;;  %v118_v48 = vld [vmem:[%s1024_s1] sm:$0xff] }
  0x1f   :  { %101 = vadd.xlane.f32.xlu1 %v100_v16  ;;  %1037 = vst [vmem:[#allocation14_spill] sm:$0xff] %v893_v43  ;;  %v897_v45 = vld [vmem:[#allocation2 + $0x78] sm:$0xff]  ;;  %v115_v46 = vadd.f32 %v893_v43, %v891_v42  ;;  %v119_v49 = vld [vmem:[%s1024_s1 + $0x8] sm:$0xff]  ;;  %v120_v52 = vld [vmem:[%s1024_s1 + $0x10] sm:$0xff] }
  0x20   :  { %77 = vadd.xlane.f32.xlu0 %v76_v17  ;;  %v91_v47 = vadd.f32 %v897_v45, %v895_v44  ;;  %v647_v50 = vpack.c.bf16 %v119_v49, %v118_v48  ;;  %v121_v53 = vld [vmem:[%s1024_s1 + $0x18] sm:$0xff]  ;;  %v122_v55 = vld [vmem:[%s1024_s1 + $0x20] sm:$0xff]  ;;  %v123_v56 = vld [vmem:[%s1024_s1 + $0x28] sm:$0xff]  ;;  %v150_v17 = vand.u32 127, %v149_v10 }
  0x21   :  { %v650_v54 = vpack.c.bf16 %v121_v53, %v120_v52  ;;  %v653_v57 = vpack.c.bf16 %v123_v56, %v122_v55  ;;  %v124_v58 = vld [vmem:[%s1024_s1 + $0x30] sm:$0xff]  ;;  %v125_v59 = vld [vmem:[%s1024_s1 + $0x38] sm:$0xff] }
  0x22   :  { %648 = vmatpush3.bf16.msra.mxu0 %v647_v50  ;;  %v656_v60 = vpack.c.bf16 %v125_v59, %v124_v58  ;;  %v183_v48 = vadd.s32 4294967256, %v150_v17  ;;  %v190_v50 = vadd.s32 4294967248, %v150_v17  ;;  %v197_v58 = vadd.s32 4294967240, %v150_v17 }
  0x23   :  { %104 = vadd.xlane.f32.xlu1 %v103_v22  ;;  %649 = vmatprep.subr.bf16.mxu0 %v750_v51 }
  0x24   :  { %80 = vadd.xlane.f32.xlu0 %v79_v23  ;;  %v155_v23 = vadd.s32 4294967288, %v150_v17 }
  0x26   :  { %651 = vmatpush3.bf16.msra.mxu0 %v650_v54 }
  0x27   :  { %107 = vadd.xlane.f32.xlu1 %v106_v28  ;;  %652 = vmatprep.subr.bf16.mxu0 %v750_v51 }
  0x28   :  { %83 = vadd.xlane.f32.xlu0 %v82_v29  ;;  %v162_v29 = vadd.s32 4294967280, %v150_v17 }
  0x2a   :  { %654 = vmatpush3.bf16.msra.mxu0 %v653_v57 }
  0x2b   :  { %110 = vadd.xlane.f32.xlu1 %v109_v34  ;;  %655 = vmatprep.subr.bf16.mxu0 %v750_v51  ;;  %v927_v34 = vshrl.u32 %v149_v10, 7 }
  0x2c   :  { %86 = vadd.xlane.f32.xlu0 %v85_v35  ;;  %v169_v35 = vadd.s32 4294967272, %v150_v17 }
  0x2d   :  { %v165_v49 = vsub.s32 %v162_v29, %v927_v34  ;;  %v153_v51 = vsub.s32 %v150_v17, %v927_v34  ;;  %v186_v56 = vsub.s32 %v183_v48, %v927_v34  ;;  %v193_v61 = vsub.s32 %v190_v50, %v927_v34 }
  0x2e   :  { %657 = vmatpush3.bf16.msra.mxu0 %v656_v60  ;;  %v172_v52 = vsub.s32 %v169_v35, %v927_v34 }
  0x2f   :  { %113 = vadd.xlane.f32.xlu1 %v112_v40  ;;  %v176_v40 = vadd.s32 4294967264, %v150_v17 }
  0x30   :  { %89 = vadd.xlane.f32.xlu0 %v88_v41 }
  0x31   :  { %v179_v53 = vsub.s32 %v176_v40, %v927_v34 }
  0x33   :  { %116 = vadd.xlane.f32.xlu1 %v115_v46  ;;  %v158_v46 = vsub.s32 %v155_v23, %v927_v34 }
  0x34   :  { %92 = vadd.xlane.f32.xlu0 %v91_v47 }
  0xa4   :  { %v96_v62 = vpop.xlane.xlu1 %95 }
  0xa5   :  { %v72_v63 = vpop.xlane.xlu0 %71  ;;  %v207_v10 = vrot.slane %v96_v62, %v153_v51 }
  0xa6   :  { %v154_v35 = vrot.slane %v72_v63, %v153_v51 }
  0xa8   :  { %v99_v3 = vpop.xlane.xlu1 %98 }
  0xa9   :  { %v75_v7 = vpop.xlane.xlu0 %74  ;;  %v211_v55 = vrot.slane %v99_v3, %v158_v46 }
  0xaa   :  { %v159_v59 = vrot.slane %v75_v7, %v158_v46  ;;  %v200_v7 = vsub.s32 %v197_v58, %v927_v34 }
  0xab   :  { %v212_v3 = vsel %vm160_vm1, %v211_v55, %v207_v10 }
  0xac   :  { %v102_v11 = vpop.xlane.xlu1 %101 }
  0xad   :  { %v78_v16 = vpop.xlane.xlu0 %77  ;;  %v216_v60 = vrot.slane %v102_v11, %v165_v49  ;;  %v161_v11 = vsel %vm160_vm1, %v159_v59, %v154_v35  ;;  %v603_v59 = vld [vmem:[%s1025_s2] ss:$0 sm:$0xff]  ;;  %s754_s2 = smov [#allocation6]  }
  0xae   :  { %v166_v23 = vrot.slane %v78_v16, %v165_v49 }
  0xaf   :  { %v217_v17 = vsel %vm167_vm2, %v216_v60, %v212_v3 }
  0xb0   :  { %v105_v22 = vpop.xlane.xlu1 %104 }
  0xb1   :  { %v81_v28 = vpop.xlane.xlu0 %80  ;;  %v221_v29 = vrot.slane %v105_v22, %v172_v52  ;;  %v168_v22 = vsel %vm167_vm2, %v166_v23, %v161_v11 }
  0xb2   :  { %v173_v43 = vrot.slane %v81_v28, %v172_v52 }
  0xb3   :  { %v222_v63 = vsel %vm174_vm3, %v221_v29, %v217_v17  ;;  %v605_v29 = vld [vmem:[%s1027_s4] ss:$0 sm:$0xff]  ;;  %v753_v17 = vmov 1966171168  }
  0xb4   :  { %v108_v41 = vpop.xlane.xlu1 %107 }
  0xb5   :  { %v84_v47 = vpop.xlane.xlu0 %83  ;;  %v226_v42 = vrot.slane %v108_v41, %v179_v53  ;;  %v175_v41 = vsel %vm174_vm3, %v173_v43, %v168_v22  ;;  %v438_v22 = vsub.s32 0, %v927_v34 }
  0xb6   :  { %v180_v31 = vrot.slane %v84_v47, %v179_v53 }
  0xb7   :  { %v227_v46 = vsel %vm181_vm4, %v226_v42, %v222_v63  ;;  %v319_v42 = vld [vmem:[%s1026_s3] sm:$0xff] }
  0xb8   :  { %v111_v54 = vpop.xlane.xlu1 %110  ;;  %v182_v49 = vsel %vm181_vm4, %v180_v31, %v175_v41  ;;  %v320_v31 = vld [vmem:[%s1026_s3 + $0x8] sm:$0xff]  ;;  %s587_s3 = sshll.u32 %s754_s2, 4  ;;  %s588_s3 = int_to_ptr.vmem [resolvable:$true] %s587_s3 }
  0xb9   :  { %v87_v57 = vpop.xlane.xlu0 %86  ;;  %v231_v48 = vrot.slane %v111_v54, %v186_v56  ;;  %v659_v58 = vpack.c.bf16 %v320_v31, %v319_v42  ;;  %s697_s4 = scalar_lea.vmem %s588_s3, 32  ;;  %p702_p9 = scmp.lt.s32.totalorder %s588_s3, %s588_s3 }
  0xba   :  { %v187_v62 = vrot.slane %v87_v57, %v186_v56  ;;  %p698_p8 = scmp.ne.s32.totalorder %s588_s3, %s697_s4  ;;  %p703_p10 = scmp.lt.s32.totalorder %s697_s4, %s697_s4 }
  0xbb   :  { %v232_v50 = vsel %vm188_vm5, %v231_v48, %v227_v46  ;;  %660 = vmatpush3.bf16.msra.mxu1 %v659_v58 }
  0xbc   :  { %v114_v40 = vpop.xlane.xlu1 %113  ;;  %v189_v53 = vsel %vm188_vm5, %v187_v62, %v182_v49  ;;  %v410_v62 = vunpack.c.l.s4 %v753_v17  ;;  %p704_p11 = por %p703_p10, %p702_p9 }
  0xbd   :  { %v90_v30 = vpop.xlane.xlu0 %89  ;;  %v236_v16 = vrot.slane %v114_v40, %v193_v61 }
  0xbe   :  { %v194_v28 = vrot.slane %v90_v30, %v193_v61  ;;  %p705_p12 = pnand %p704_p11, %p698_p8 }
  0xbf   :  { %v237_v54 = vsel %vm195_vm6, %v236_v16, %v232_v50  ;;  %v411_v16 = vunpack.c.0.s8 %v410_v62 }
  0xc0   :  { %v117_v47 = vpop.xlane.xlu1 %116  ;;  %v196_v56 = vsel %vm195_vm6, %v194_v28, %v189_v53 }
  0xc1   :  { %v241_v51 = vrot.slane %v117_v47, %v200_v7  ;;  %v93_v52 = vpop.xlane.xlu0 %92  ;;  %v414_v63 = vsub.s32 %v411_v16, %v927_v34 }
  0xc2   :  { %v201_v55 = vrot.slane %v93_v52, %v200_v7 }
  0xc3   :  { %v242_v57 = vsel %vm202_vm7, %v241_v51, %v237_v54  ;;  %v473_v51 = vsub.s32 1, %v927_v34 }
  0xc4   :  { %v203_v30 = vsel %vm202_vm7, %v201_v55, %v196_v56 }
  0xc5   :  { %v244_v43 = vsel %vm243_vm8, %v242_v57, %v203_v30 }
  0xc6   :  { %637 = vmatmul.mubr.msk.f32.vlgmr.msra.gmra.mrb[0].mxu0 %vm245_vm9, %v244_v43 }
 0x199   :  { %v314_v60 = vpop.f32.mrb[0].mxu0 }
 0x19a   :  { %v315_v61 = vadd.f32 %v603_v59, %v314_v60  ;;  %v638_v10 = vpop.f32.mrb[1].mxu0 }
 0x19c   :  { %v318_v23 = vmax.f32 %v315_v61, 0.0 }
 0x19e   :  { %644 = vmatmul.mubr.msk.f32.vlgmr.msra.gmra.mrb[0].mxu1 %vm328_vm10, %v318_v23 }
 0x271   :  { %v398_v35 = vpop.f32.mrb[0].mxu1 }
 0x272   :  { %v399_v40 = vadd.f32 %v605_v29, %v398_v35  ;;  %v645_v3 = vpop.f32.mrb[1].mxu1 }
 0x274   :  { %v607_v48 = vmul.f32 -1.442695, %v399_v40 }
 0x276   :  { %671 = vpow2.f32 %v607_v48 }
 0x280   :  { %v672_v7 = vpop.eup %671 }
 0x281   :  { %v405_v11 = vadd.f32 1.0, %v672_v7 }
 0x283   :  { %673 = vrcp.f32 %v405_v11 }
 0x28d   :  { %v674_v28 = vpop.eup %673 }
 0x28e   :  { %v439_v41 = vrot.slane %v674_v28, %v438_v22  ;;  %v415_v46 = vrot.slane %v674_v28, %v414_v63  ;;  %v474_v52 = vrot.slane %v674_v28, %v473_v51 }
 0x290   :  { %445 = vbcast.lane.b32.xlu1 %v439_v41, 264  ;;  %441 = vbcast.lane.b32.xlu0 %v439_v41, 256  ;;  %v416_v47 = vcombine.high %v415_v46, %v415_v46  ;;  %v423_v49 = vrot.slane %v415_v46, %v414_v63 }
 0x292   :  { %v430_v50 = vrot.slane %v416_v47, %v414_v63  ;;  %434 = vst.msk [vmem:[#allocation6] sm:$0x1] %vm433_vm11, %v423_v49 }
 0x294   :  { %449 = vbcast.lane.b32.xlu1 %v439_v41, 272  ;;  %457 = vbcast.lane.b32.xlu0 %v439_v41, 288  ;;  %435 = vst.msk [vmem:[#allocation6 + $0x1] sm:$0x1] %vm433_vm11, %v430_v50 }
 0x298   :  { %453 = vbcast.lane.b32.xlu1 %v439_v41, 280  ;;  %465 = vbcast.lane.b32.xlu0 %v439_v41, 304 }
 0x29c   :  { %461 = vbcast.lane.b32.xlu1 %v439_v41, 296  ;;  %476 = vbcast.lane.b32.xlu0 %v474_v52, 256 }
 0x2a0   :  { %469 = vbcast.lane.b32.xlu1 %v439_v41, 312  ;;  %484 = vbcast.lane.b32.xlu0 %v474_v52, 272 }
 0x2a4   :  { %480 = vbcast.lane.b32.xlu1 %v474_v52, 264  ;;  %492 = vbcast.lane.b32.xlu0 %v474_v52, 288 }
 0x2a5   :  { %708 = shalt.err (!%p705_p12)
}
 0x2a6   :  { %s709_s12 = scalar_lea.hbm %s1029_s6, 32 }
 0x2a7   :  { %p710_p13 = scmp.ne.s32.totalorder %s1029_s6, %s709_s12  ;;  %p713_p0 = scmp.lt.u32.totalorder %s709_s12, %s1029_s6 }
 0x2a9   :  { %p715_p1 = pnand %p713_p0, %p710_p13 }
 0x2ab   :  { %718 = shalt.err (!%p715_p1)
}
 0x2ac   :  { %s755_s17 = smov 1   ;;  %488 = vbcast.lane.b32.xlu1 %v474_v52, 280  ;;  %500 = vbcast.lane.b32.xlu0 %v474_v52, 304  ;;  %v1039_v7 = vld [vmem:[#allocation12_spill] sm:$0xff]  ;;  %v1040_v17 = vld [vmem:[#allocation13_spill] sm:$0xff]  ;;  %v1041_v62 = vld [vmem:[#allocation14_spill] sm:$0xff] }
 0x2ad   :  { %593 = dma.vmem_to_hbm [thread:$0]  %s588_s3, 32, %s1029_s6, [#allocation7], %s749_s8, %s749_s8, %s755_s17  }
 0x2ae   :  { %s756_s6 = smov [#allocation5]  }
 0x2af   :  { %s575_s20 = sshll.u32 %s756_s6, 4  ;;  %s576_s20 = int_to_ptr.vmem [resolvable:$true] %s575_s20 }
 0x2b0   :  { %496 = vbcast.lane.b32.xlu1 %v474_v52, 296  ;;  %s719_s21 = scalar_lea.vmem %s576_s20, 4096  ;;  %p724_p3 = scmp.lt.s32.totalorder %s576_s20, %s576_s20 }
 0x2b1   :  { %p720_p2 = scmp.ne.s32.totalorder %s576_s20, %s719_s21  ;;  %p725_p4 = scmp.lt.s32.totalorder %s719_s21, %s719_s21 }
 0x2b3   :  { %p726_p5 = por %p725_p4, %p724_p3 }
 0x2b4   :  { %504 = vbcast.lane.b32.xlu1 %v474_v52, 312 }
 0x2b5   :  { %p727_p6 = pnand %p726_p5, %p720_p2 }
 0x302   :  { %v446_v34 = vpop.permute.xlu1 %445  ;;  %v442_v53 = vpop.permute.xlu0 %441 }
 0x303   :  { %v508_v54 = vmul.f32 %v446_v34, %v823_v8  ;;  %v509_v55 = vmul.f32 %v446_v34, %v825_v9  ;;  %v506_v56 = vmul.f32 %v442_v53, %v811_v2  ;;  %v507_v57 = vmul.f32 %v442_v53, %v815_v4 }
 0x305   :  { %540 = vst [vmem:[#allocation5 + $0x10] sm:$0xff] %v508_v54  ;;  %541 = vst [vmem:[#allocation5 + $0x18] sm:$0xff] %v509_v55 }
 0x306   :  { %538 = vst [vmem:[#allocation5] sm:$0xff] %v506_v56  ;;  %539 = vst [vmem:[#allocation5 + $0x8] sm:$0xff] %v507_v57  ;;  %v450_v30 = vpop.permute.xlu1 %449  ;;  %v458_v43 = vpop.permute.xlu0 %457 }
 0x307   :  { %v510_v42 = vmul.f32 %v450_v30, %v835_v14  ;;  %v511_v31 = vmul.f32 %v450_v30, %v837_v15  ;;  %v514_v58 = vmul.f32 %v458_v43, %v859_v26  ;;  %v515_v8 = vmul.f32 %v458_v43, %v861_v27 }
 0x309   :  { %542 = vst [vmem:[#allocation5 + $0x20] sm:$0xff] %v510_v42  ;;  %543 = vst [vmem:[#allocation5 + $0x28] sm:$0xff] %v511_v31 }
 0x30a   :  { %546 = vst [vmem:[#allocation5 + $0x40] sm:$0xff] %v514_v58  ;;  %547 = vst [vmem:[#allocation5 + $0x48] sm:$0xff] %v515_v8  ;;  %v454_v2 = vpop.permute.xlu1 %453  ;;  %v466_v4 = vpop.permute.xlu0 %465 }
 0x30b   :  { %v512_v9 = vmul.f32 %v454_v2, %v847_v20  ;;  %v513_v59 = vmul.f32 %v454_v2, %v849_v21  ;;  %v518_v60 = vmul.f32 %v466_v4, %v883_v38  ;;  %v519_v14 = vmul.f32 %v466_v4, %v885_v39 }
 0x30d   :  { %544 = vst [vmem:[#allocation5 + $0x30] sm:$0xff] %v512_v9  ;;  %545 = vst [vmem:[#allocation5 + $0x38] sm:$0xff] %v513_v59 }
 0x30e   :  { %550 = vst [vmem:[#allocation5 + $0x60] sm:$0xff] %v518_v60  ;;  %551 = vst [vmem:[#allocation5 + $0x68] sm:$0xff] %v519_v14  ;;  %v462_v15 = vpop.permute.xlu1 %461  ;;  %v477_v26 = vpop.permute.xlu0 %476 }
 0x30f   :  { %v516_v27 = vmul.f32 %v462_v15, %v871_v32  ;;  %v517_v61 = vmul.f32 %v462_v15, %v873_v33  ;;  %v522_v10 = vmul.f32 %v477_v26, %v807_v0  ;;  %v523_v20 = vmul.f32 %v477_v26, %v809_v1 }
 0x311   :  { %548 = vst [vmem:[#allocation5 + $0x50] sm:$0xff] %v516_v27  ;;  %549 = vst [vmem:[#allocation5 + $0x58] sm:$0xff] %v517_v61 }
 0x312   :  { %554 = vst [vmem:[#allocation5 + $0x80] sm:$0xff] %v522_v10  ;;  %555 = vst [vmem:[#allocation5 + $0x88] sm:$0xff] %v523_v20  ;;  %v470_v21 = vpop.permute.xlu1 %469  ;;  %v485_v38 = vpop.permute.xlu0 %484 }
 0x313   :  { %v520_v39 = vmul.f32 %v470_v21, %v895_v44  ;;  %v521_v23 = vmul.f32 %v470_v21, %v897_v45  ;;  %v526_v29 = vmul.f32 %v485_v38, %v831_v12  ;;  %v527_v32 = vmul.f32 %v485_v38, %v833_v13 }
 0x315   :  { %552 = vst [vmem:[#allocation5 + $0x70] sm:$0xff] %v520_v39  ;;  %553 = vst [vmem:[#allocation5 + $0x78] sm:$0xff] %v521_v23 }
 0x316   :  { %558 = vst [vmem:[#allocation5 + $0xa0] sm:$0xff] %v526_v29  ;;  %559 = vst [vmem:[#allocation5 + $0xa8] sm:$0xff] %v527_v32  ;;  %v481_v0 = vpop.permute.xlu1 %480  ;;  %v493_v1 = vpop.permute.xlu0 %492 }
 0x317   :  { %v524_v33 = vmul.f32 %v481_v0, %v817_v5  ;;  %v525_v35 = vmul.f32 %v481_v0, %v819_v6  ;;  %v530_v40 = vmul.f32 %v493_v1, %v855_v24  ;;  %v531_v44 = vmul.f32 %v493_v1, %v857_v25  ;;  %v1038_v24 = vld [vmem:[#allocation11_spill] sm:$0xff] }
 0x319   :  { %556 = vst [vmem:[#allocation5 + $0x90] sm:$0xff] %v524_v33  ;;  %557 = vst [vmem:[#allocation5 + $0x98] sm:$0xff] %v525_v35 }
 0x31a   :  { %562 = vst [vmem:[#allocation5 + $0xc0] sm:$0xff] %v530_v40  ;;  %563 = vst [vmem:[#allocation5 + $0xc8] sm:$0xff] %v531_v44 }
 0x31e   :  { %v489_v12 = vpop.permute.xlu1 %488  ;;  %v501_v13 = vpop.permute.xlu0 %500 }
 0x31f   :  { %v528_v45 = vmul.f32 %v489_v12, %v843_v18  ;;  %v529_v3 = vmul.f32 %v489_v12, %v845_v19  ;;  %v534_v48 = vmul.f32 %v501_v13, %v879_v36  ;;  %v535_v5 = vmul.f32 %v501_v13, %v881_v37 }
 0x321   :  { %560 = vst [vmem:[#allocation5 + $0xb0] sm:$0xff] %v528_v45  ;;  %561 = vst [vmem:[#allocation5 + $0xb8] sm:$0xff] %v529_v3 }
 0x322   :  { %566 = vst [vmem:[#allocation5 + $0xe0] sm:$0xff] %v534_v48  ;;  %567 = vst [vmem:[#allocation5 + $0xe8] sm:$0xff] %v535_v5  ;;  %v497_v6 = vpop.permute.xlu1 %496 }
 0x323   :  { %v532_v25 = vmul.f32 %v497_v6, %v1038_v24  ;;  %v533_v11 = vmul.f32 %v497_v6, %v1039_v7 }
 0x325   :  { %564 = vst [vmem:[#allocation5 + $0xd0] sm:$0xff] %v532_v25  ;;  %565 = vst [vmem:[#allocation5 + $0xd8] sm:$0xff] %v533_v11 }
 0x326   :  { %v505_v18 = vpop.permute.xlu1 %504 }
 0x327   :  { %v536_v19 = vmul.f32 %v505_v18, %v1040_v17  ;;  %v537_v36 = vmul.f32 %v505_v18, %v1041_v62 }
 0x329   :  { %568 = vst [vmem:[#allocation5 + $0xf0] sm:$0xff] %v536_v19  ;;  %569 = vst [vmem:[#allocation5 + $0xf8] sm:$0xff] %v537_v36 }
 0x32a   :  { %730 = shalt.err (!%p727_p6)
}
 0x32b   :  { %s731_s24 = scalar_lea.hbm %s1028_s5, 4096 }
 0x32c   :  { %p732_p7 = scmp.ne.s32.totalorder %s1028_s5, %s731_s24  ;;  %p735_p8 = scmp.lt.u32.totalorder %s731_s24, %s1028_s5 }
 0x32e   :  { %p737_p9 = pnand %p735_p8, %p732_p7 }
 0x330   :  { %740 = shalt.err (!%p737_p9)
}
 0x331   :  { %581 = dma.vmem_to_hbm [thread:$0]  %s576_s20, 4096, %s1028_s5, [#allocation4], %s748_s7, %s748_s7, %s749_s8  }
 0x332   :  { %743 = dma.done.wait [#allocation4], 4096  }
 0x333   :  { %744 = vsyncadd [#allocation4], 4294963200 }
 0x334   :  { %745 = dma.done.wait [#allocation7], 32  }
 0x335   :  { %746 = vsyncadd [#allocation7], 4294967264 }
 0x336   :  { %600 = vsyncpa [#allocation3], 1 }
 0x337   :  { %601 = vsyncpa [#allocation4], 1 }
 0x338   :  { %602 = vsyncpa [#allocation7], 1 }

</bundles_post_ra>
